<compile_context>
chip_gen: v6e
topology: v6e:2x2x1
jax: 0.10.0
libtpu: 0.0.40
codegen_flags: <defaults>
</compile_context>

<pallas_src>
import functools

import numpy as np
import jax
import jax.numpy as jnp
from jax import lax
from jax.experimental import pallas as pl
from jax.experimental.pallas import tpu as pltpu

SPATIAL = 7 * 7          # the module hard-codes a 7x7 feature map
LANE_W = 1024            # lane-dense width (multiple of 128)
MAX_TILE_ROWS = 512      # rows per grid step (multiple of 8); 512x1024 f32 = 2 MiB/buffer


def _round_up(x, m):
    return ((x + m - 1) // m) * m


def _projector_kernel(seed_ref, x_ref, o_ref, *, use_tanh, p, training):
    """Elementwise hot path on one lane-dense (tile_rows, LANE_W) tile:
    tanh + (training-mode) inverted dropout."""
    x = x_ref[...]

    if use_tanh:
        x = jnp.tanh(x)

    if training and p > 0.0:
        rows, width = x_ref.shape
        # Unique uint32 counter per element across the whole grid.
        base = pl.program_id(0).astype(jnp.uint32) * np.uint32(rows * width)
        local = (lax.broadcasted_iota(jnp.int32, (rows, width), 0) * width
                 + lax.broadcasted_iota(jnp.int32, (rows, width), 1))
        idx = base + local.astype(jnp.uint32)

        # Counter-based hash (lowbias32 finalizer) mixed with the call seed.
        h = idx * np.uint32(0x9E3779B9) + seed_ref[0].astype(jnp.uint32)
        h = h ^ (h >> 16)
        h = h * np.uint32(0x7FEB352D)
        h = h ^ (h >> 15)
        h = h * np.uint32(0x846CA68B)
        h = h ^ (h >> 16)

        # Integer threshold compare: drop with probability p.
        threshold = np.uint32(min(int(p * 2.0 ** 32), 2 ** 32 - 1))
        keep = h >= threshold
        x = jnp.where(keep, x * (1.0 / (1.0 - p)), 0.0)

    o_ref[...] = x.astype(o_ref.dtype)


def image_local_features_projector(
    x,
    *,
    nfeats,
    dropout=0.0,
    use_nonlinear_projection=True,
    training=True,
    seed=0,
):
    """x: (B, 7, 7, nfeats) channels-last image features.

    Returns: (B, 49, nfeats), same dtype as x.
    """
    total = int(np.prod(x.shape))
    assert total % (SPATIAL * nfeats) == 0, "input does not flatten to (-1, 49, nfeats)"
    n_batch = total // (SPATIAL * nfeats)

    # Glue: reshape to a lane-dense 2D slab (valid because the op is elementwise).
    rows = max(8, _round_up(pl.cdiv(total, LANE_W), 8))
    tile_rows = min(MAX_TILE_ROWS, rows)
    grid_n = pl.cdiv(rows, tile_rows)
    rows = grid_n * tile_rows
    padded_total = rows * LANE_W

    flat = x.reshape(-1)
    if padded_total != total:
        flat = jnp.pad(flat, (0, padded_total - total))
    x2 = flat.reshape(rows, LANE_W)

    kernel = functools.partial(
        _projector_kernel,
        use_tanh=bool(use_nonlinear_projection),
        p=float(dropout),
        training=bool(training),
    )
    seed_arr = jnp.asarray([seed], dtype=jnp.int32)

    out2 = pl.pallas_call(
        kernel,
        out_shape=jax.ShapeDtypeStruct((rows, LANE_W), x.dtype),
        grid_spec=pltpu.PrefetchScalarGridSpec(
            num_scalar_prefetch=1,  # dropout RNG seed lives in SMEM
            grid=(grid_n,),
            in_specs=[pl.BlockSpec((tile_rows, LANE_W), lambda i, seed: (i, 0))],
            out_specs=pl.BlockSpec((tile_rows, LANE_W), lambda i, seed: (i, 0)),
        ),
        compiler_params=pltpu.CompilerParams(
            dimension_semantics=("parallel",),  # hash RNG is order-independent
        ),
    )(seed_arr, x2)

    return out2.reshape(-1)[:total].reshape(n_batch, SPATIAL, nfeats)


if __name__ == "__main__":
    key = jax.random.PRNGKey(0)
    B, NFEATS = 2, 32
    x = jax.random.normal(key, (B, 7, 7, NFEATS), dtype=jnp.float32)

    # 1) eval-mode path (dropout is identity) -> exact pure-JAX reference
    out_eval = image_local_features_projector(
        x,
        nfeats=NFEATS,
        dropout=0.3,
        use_nonlinear_projection=True,
        training=False,
    )
    jax.block_until_ready(out_eval)
    ref = jnp.tanh(x.reshape(-1, SPATIAL, NFEATS))
    assert out_eval.shape == (B, SPATIAL, NFEATS)
    assert jnp.allclose(out_eval, ref, atol=1e-5), "eval-mode mismatch vs reference"

    # 2) training-mode path (tanh + inverted dropout, in-kernel hash RNG)
    p = 0.3
    out_train = image_local_features_projector(
        x,
        nfeats=NFEATS,
        dropout=p,
        use_nonlinear_projection=True,
        training=True,
        seed=1234,
    )
    jax.block_until_ready(out_train)
    assert out_train.shape == (B, SPATIAL, NFEATS)

    kept = out_train != 0.0
    dropped_frac = 1.0 - float(jnp.mean(kept))
    assert 0.15 < dropped_frac < 0.45, f"dropout mask looks degenerate: {dropped_frac}"
    # survivors are exactly tanh(x) / (1 - p)
    expected_kept = ref / (1.0 - p)
    assert jnp.allclose(
        jnp.where(kept, out_train, 0.0),
        jnp.where(kept, expected_kept, 0.0),
        atol=1e-5,
    ), "survivor scaling mismatch"

    print("KERNEL_OK")
</pallas_src>

<mosaic_0001>
module attributes {stable_mosaic.version = 11 : i64} {
  func.func @_projector_kernel(%arg0: i32, %arg1: memref<1xi32, #tpu.memory_space<smem>>, %arg2: memref<8x1024xf32, #tpu.memory_space<vmem>>, %arg3: memref<8x1024xf32, #tpu.memory_space<vmem>>) attributes {dimension_semantics = [#tpu.dimension_semantics<parallel>], iteration_bounds = array<i64: 1>, scalar_prefetch = 1 : i64, scratch_operands = 0 : i64, tpu.core_type = #tpu.core_type<tc>, window_params = [{transform_indices = @transform_0, window_bounds = array<i64: 8, 1024>}, {transform_indices = @transform_1, window_bounds = array<i64: 8, 1024>}]} {
    %c0 = arith.constant 0 : index
    %c0_0 = arith.constant 0 : index
    %0 = vector.load %arg2[%c0, %c0_0] : memref<8x1024xf32, #tpu.memory_space<vmem>>, vector<8x1024xf32>
    %1 = math.tanh %0 : vector<8x1024xf32>
    %c0_1 = arith.constant 0 : index
    %c0_2 = arith.constant 0 : index
    %2 = vector.load %arg3[%c0_1, %c0_2] : memref<8x1024xf32, #tpu.memory_space<vmem>>, vector<8x1024xf32>
    tpu.vector_store %arg3[%c0_1, %c0_2], %1 {strides = array<i32>} : memref<8x1024xf32, #tpu.memory_space<vmem>>, vector<8x1024xf32>,
    return
  }
  func.func @transform_0(%arg0: i32, %arg1: memref<1xi32, #tpu.memory_space<smem>>) -> (i32, i32) {
    %c0_i32 = arith.constant 0 : i32
    %c0_i32_0 = arith.constant 0 : i32
    return %arg0, %c0_i32 : i32, i32
  }
  func.func @transform_1(%arg0: i32, %arg1: memref<1xi32, #tpu.memory_space<smem>>) -> (i32, i32) {
    %c0_i32 = arith.constant 0 : i32
    %c0_i32_0 = arith.constant 0 : i32
    return %arg0, %c0_i32 : i32, i32
  }
}

</mosaic_0001>

<bundles_post_ra>
// kernel: tpu_custom_call.1
= control target key start
LH: loop header
LB: loop body
LE: loop exit
PB: predicated region body
PF: predicated region fallthrough
CT: control target
= control target key end

     0   :  { %8 = vsyncpa [#allocation5], 0  ;;  %s147_s0 = inlined_call_operand.<no memory space> [shape: s32[1], index: 0, kind: input, shape index: {}]   ;;  %s148_s1 = inlined_call_operand.hbm [shape: f32[8,1024], index: 1, kind: input, shape index: {}]   ;;  %s149_s2 = inlined_call_operand.hbm [shape: f32[8,1024], index: 2, kind: output, shape index: {}]  }
   0x1   :  { %9 = vsyncpa [#allocation6], 0  ;;  %s124_s9 = smov [#allocation4]  }
   0x2   :  { %s16_s10 = sshll.u32 %s124_s9, 4  ;;  %s17_s10 = int_to_ptr.vmem [resolvable:$true] %s16_s10 }
   0x3   :  { %s88_s11 = scalar_lea.vmem %s17_s10, 1024  ;;  %p93_p1 = scmp.lt.s32.totalorder %s17_s10, %s17_s10 }
   0x4   :  { %p89_p0 = scmp.ne.s32.totalorder %s17_s10, %s88_s11  ;;  %p94_p2 = scmp.lt.s32.totalorder %s88_s11, %s88_s11 }
   0x6   :  { %p95_p3 = por %p94_p2, %p93_p1 }
   0x8   :  { %p96_p4 = pnand %p95_p3, %p89_p0 }
   0xa   :  { %99 = shalt.err (!%p96_p4)
}
   0xb   :  { %19 = dma.hbm_to_vmem [thread:$0]  %s148_s1, 1024, %s17_s10, [#allocation5]  }
   0xc   :  { %120 = dma.done.wait [#allocation5], 1024  }
   0xd   :  { %121 = vsyncadd [#allocation5], 4294966272  ;;  %v23_v0 = vld [vmem:[#allocation4] sm:$0xff]  ;;  %v24_v1 = vld [vmem:[#allocation4 + $0x8] sm:$0xff]  ;;  %s125_s1 = smov [#allocation7]  }
   0xe   :  { %v25_v2 = vld [vmem:[#allocation4 + $0x10] sm:$0xff]  ;;  %64 = vtanh.f32 %v23_v0  ;;  %v26_v3 = vld [vmem:[#allocation4 + $0x18] sm:$0xff]  ;;  %v27_v4 = vld [vmem:[#allocation4 + $0x20] sm:$0xff]  ;;  %s53_s13 = sshll.u32 %s125_s1, 4  ;;  %s54_s13 = int_to_ptr.vmem [resolvable:$true] %s53_s13 }
   0xf   :  { %66 = vtanh.f32 %v24_v1  ;;  %v28_v5 = vld [vmem:[#allocation4 + $0x28] sm:$0xff]  ;;  %v29_v6 = vld [vmem:[#allocation4 + $0x30] sm:$0xff]  ;;  %v30_v7 = vld [vmem:[#allocation4 + $0x38] sm:$0xff]  ;;  %s100_s14 = scalar_lea.vmem %s54_s13, 1024  ;;  %p105_p6 = scmp.lt.s32.totalorder %s54_s13, %s54_s13 }
  0x10   :  { %68 = vtanh.f32 %v25_v2  ;;  %p101_p5 = scmp.ne.s32.totalorder %s54_s13, %s100_s14  ;;  %p106_p7 = scmp.lt.s32.totalorder %s100_s14, %s100_s14 }
  0x11   :  { %70 = vtanh.f32 %v26_v3 }
  0x12   :  { %72 = vtanh.f32 %v27_v4  ;;  %p107_p8 = por %p106_p7, %p105_p6 }
  0x13   :  { %74 = vtanh.f32 %v28_v5 }
  0x14   :  { %76 = vtanh.f32 %v29_v6  ;;  %p108_p9 = pnand %p107_p8, %p101_p5 }
  0x15   :  { %78 = vtanh.f32 %v30_v7 }
  0x1b   :  { %v65_v8 = vpop.eup %64 }
  0x1c   :  { %v67_v9 = vpop.eup %66  ;;  %39 = vst [vmem:[#allocation7] sm:$0xff] %v65_v8 }
  0x1d   :  { %v69_v10 = vpop.eup %68  ;;  %40 = vst [vmem:[#allocation7 + $0x8] sm:$0xff] %v67_v9 }
  0x1e   :  { %v71_v11 = vpop.eup %70  ;;  %41 = vst [vmem:[#allocation7 + $0x10] sm:$0xff] %v69_v10 }
  0x1f   :  { %v73_v12 = vpop.eup %72  ;;  %42 = vst [vmem:[#allocation7 + $0x18] sm:$0xff] %v71_v11 }
  0x20   :  { %v75_v13 = vpop.eup %74  ;;  %43 = vst [vmem:[#allocation7 + $0x20] sm:$0xff] %v73_v12 }
  0x21   :  { %v77_v14 = vpop.eup %76  ;;  %44 = vst [vmem:[#allocation7 + $0x28] sm:$0xff] %v75_v13 }
  0x22   :  { %v79_v15 = vpop.eup %78  ;;  %45 = vst [vmem:[#allocation7 + $0x30] sm:$0xff] %v77_v14 }
  0x23   :  { %46 = vst [vmem:[#allocation7 + $0x38] sm:$0xff] %v79_v15 }
  0x24   :  { %111 = shalt.err (!%p108_p9)
}
  0x25   :  { %56 = dma.vmem_to_hbm [thread:$0]  %s54_s13, 1024, %s149_s2, [#allocation6]  }
  0x26   :  { %122 = dma.done.wait [#allocation6], 1024  }
  0x27   :  { %123 = vsyncadd [#allocation6], 4294966272 }
  0x28   :  { %60 = vsyncpa [#allocation5], 1 }
  0x29   :  { %61 = vsyncpa [#allocation6], 1 }

</bundles_post_ra>
